<compile_context>
chip_gen: v7x
topology: tpu7x:2x2x1
jax: 0.10.0
libtpu: 0.0.40
codegen_flags: <defaults>
</compile_context>

<pallas_src>
import functools

import jax
import jax.numpy as jnp
from jax.experimental import pallas as pl
from jax.experimental.pallas import tpu as pltpu


# ----------------------------- helpers ------------------------------------ #

def _round_up(a, b):
    return (a + b - 1) // b * b


def _cdiv(a, b):
    return (a + b - 1) // b


def _sublane_multiple(dtype):
    # sublane packing: f32 -> 8, bf16/f16 -> 16, int8/fp8 -> 32
    return {4: 8, 2: 16, 1: 32}.get(jnp.dtype(dtype).itemsize, 8)


# ----------------------------- kernels ------------------------------------ #

def _pool_partial(x_ref, *, hw, hw_tile, needs_mask):
    """Partial global-average-pool contribution of one streamed spatial tile.

    x_ref: (b_tile, C, hw_tile) with HW on lanes.  Returns (b_tile, C) f32.
    OOB lanes of the (possibly partial) last tile are masked before the reduce.
    """
    xt = x_ref[...]
    if needs_mask:
        start = pl.program_id(1) * hw_tile
        lane = jax.lax.broadcasted_iota(jnp.int32, xt.shape, dimension=2)
        xt = jnp.where(start + lane < hw, xt, jnp.zeros((), xt.dtype))
    # Accumulate in f32 without materializing a full f32 copy of the tile.
    return jnp.sum(xt, axis=-1, dtype=jnp.float32)


def _softmax_store(att, o_ref):
    att = att - jnp.max(att, axis=-1, keepdims=True)        # stable softmax
    e = jnp.exp(att)
    inv_den = pl.reciprocal(jnp.sum(e, axis=-1, keepdims=True), approx=True)
    o_ref[:, 0, :] = (e * inv_den).astype(o_ref.dtype)


def _attention_kernel_hidden(x_ref, w1_ref, w2_ref, o_ref, acc_ref, *,
                             hw, hw_tile, needs_mask, inv_hw, inv_temp):
    # x_ref:  (b_tile, C, hw_tile)  streamed spatial tile (HW on lanes)
    # w1_ref: (C, hidden)           pre-transposed 1x1 conv weight
    # w2_ref: (hidden, K)           pre-transposed 1x1 conv weight
    # o_ref:  (b_tile, 1, K)        softmax output (resident across spatial axis)
    # acc_ref:(b_tile, C) f32       pooled-sum accumulator
    si = pl.program_id(1)

    @pl.when(si == 0)
    def _():
        acc_ref[...] = jnp.zeros_like(acc_ref)

    acc_ref[...] += _pool_partial(x_ref, hw=hw, hw_tile=hw_tile,
                                  needs_mask=needs_mask)

    @pl.when(si == pl.num_programs(1) - 1)
    def _():
        avg = acc_ref[...] * inv_hw                                  # avg pool
        h = jnp.dot(avg, w1_ref[...].astype(jnp.float32),
                    preferred_element_type=jnp.float32)              # conv 1x1
        h = jnp.maximum(h, 0.0)                                      # ReLU
        att = jnp.dot(h, w2_ref[...].astype(jnp.float32),
                      preferred_element_type=jnp.float32)            # conv 1x1
        _softmax_store(att * inv_temp, o_ref)


def _attention_kernel_single(x_ref, w_ref, o_ref, acc_ref, *,
                             hw, hw_tile, needs_mask, inv_hw, inv_temp):
    # Single 1x1 conv path (in_planes <= ratio).
    si = pl.program_id(1)

    @pl.when(si == 0)
    def _():
        acc_ref[...] = jnp.zeros_like(acc_ref)

    acc_ref[...] += _pool_partial(x_ref, hw=hw, hw_tile=hw_tile,
                                  needs_mask=needs_mask)

    @pl.when(si == pl.num_programs(1) - 1)
    def _():
        avg = acc_ref[...] * inv_hw
        att = jnp.dot(avg, w_ref[...].astype(jnp.float32),
                      preferred_element_type=jnp.float32)
        _softmax_store(att * inv_temp, o_ref)


# ----------------------------- wrapper ------------------------------------ #

def attention_forward(x_nchw, weights, *, temprature=30.0,
                      max_tile_bytes=2 * 1024 * 1024, buffer_count=2):
    """x_nchw: (B, C, H, W).  weights: (w1, w2) or (w,) of 1x1-conv weights
    stored PyTorch-style as (out_channels, in_channels).

    max_tile_bytes is the PADDED VMEM footprint budget per streamed x buffer
    (~2 MiB default is past the HBM-roofline knee and v7x-safe).  buffer_count
    > 2 requests deeper pipelining (v5e/v6e with VMEM to spare)."""
    B, C, H, W = x_nchw.shape
    HW = H * W
    out_dtype = x_nchw.dtype
    elem_bytes = jnp.dtype(x_nchw.dtype).itemsize

    # (B, C, HW): free reshape of NCHW (contiguous trailing-dim collapse).
    # No transpose, no pad -> x is streamed from HBM exactly once.
    x3 = x_nchw.reshape(B, C, HW)

    # --- batch tiling: divisor of B; >= 2 grid steps whenever B >= 2 so both
    #     v7x TensorCores stream half the data each ("parallel" axis). --------
    b_tile = 1
    for cand in (8, 4, 2, 1):
        if cand <= max(1, B // 2) and B % cand == 0:
            b_tile = cand
            break

    # --- spatial (lane) tiling sized from the PADDED VMEM footprint ----------
    sub = _sublane_multiple(x3.dtype)
    c_pad = _round_up(C, sub)                         # sublane padding of C
    row_bytes = b_tile * c_pad * elem_bytes           # bytes per padded lane col
    full_pad_bytes = _round_up(HW, 128) * row_bytes
    if HW <= 128 or full_pad_bytes <= max_tile_bytes:
        hw_tile = HW                                  # single spatial step
    else:
        cap_lanes = max(128, (max_tile_bytes // row_bytes) // 128 * 128)
        n_steps = _cdiv(HW, cap_lanes)
        hw_tile = _round_up(_cdiv(HW, n_steps), 128)  # minimize tail padding
        if hw_tile >= HW:
            hw_tile = HW

    grid = (B // b_tile, _cdiv(HW, hw_tile))
    needs_mask = (HW % hw_tile) != 0                  # ragged tail -> in-kernel mask

    inv_hw = 1.0 / float(HW)
    inv_temp = 1.0 / float(temprature)

    x_spec_kwargs = {}
    if buffer_count != 2:                              # optional deeper pipelining
        x_spec_kwargs["pipeline_mode"] = pl.Buffered(buffer_count)
    x_spec = pl.BlockSpec((b_tile, C, hw_tile), lambda bi, si: (bi, 0, si),
                          **x_spec_kwargs)

    K_out = weights[-1].shape[0]
    # Output kept 3D (B, 1, K) so the block's last two dims equal full array
    # dims for any b_tile; squeezed back to (B, K) after the call.
    out_spec = pl.BlockSpec((b_tile, 1, K_out), lambda bi, si: (bi, 0, 0))

    common = dict(hw=HW, hw_tile=hw_tile, needs_mask=needs_mask,
                  inv_hw=inv_hw, inv_temp=inv_temp)

    if len(weights) == 2:
        w1, w2 = weights
        hidden = w1.shape[0]
        w1t = jnp.asarray(w1).T                        # (C, hidden)
        w2t = jnp.asarray(w2).T                        # (hidden, K)
        kernel = functools.partial(_attention_kernel_hidden, **common)
        in_specs = [x_spec,
                    pl.BlockSpec((C, hidden), lambda bi, si: (0, 0)),
                    pl.BlockSpec((hidden, K_out), lambda bi, si: (0, 0))]
        args = (x3, w1t, w2t)
        w_itemsize = jnp.dtype(w1t.dtype).itemsize
        w_pad_bytes = (_round_up(C, 8) * _round_up(hidden, 128)
                       + _round_up(hidden, 8) * _round_up(K_out, 128)) * w_itemsize
        w_raw_bytes = w1t.size * w_itemsize + w2t.size * w_itemsize
        mm_flops = 2 * B * C * hidden + 2 * B * hidden * K_out
    else:
        (w,) = weights
        wt = jnp.asarray(w).T                          # (C, K)
        kernel = functools.partial(_attention_kernel_single, **common)
        in_specs = [x_spec,
                    pl.BlockSpec((C, K_out), lambda bi, si: (0, 0))]
        args = (x3, wt)
        w_itemsize = jnp.dtype(wt.dtype).itemsize
        w_pad_bytes = _round_up(C, 8) * _round_up(K_out, 128) * w_itemsize
        w_raw_bytes = wt.size * w_itemsize
        mm_flops = 2 * B * C * K_out

    # --- VMEM limit from padded footprints (lane->128, sublane->dtype mult) --
    out_itemsize = jnp.dtype(out_dtype).itemsize
    x_buf_bytes = b_tile * c_pad * _round_up(hw_tile, 128) * elem_bytes
    out_buf_bytes = b_tile * _sublane_multiple(out_dtype) * _round_up(K_out, 128) * out_itemsize
    acc_bytes = _round_up(b_tile, 8) * _round_up(C, 128) * 4
    vmem_needed = (max(buffer_count, 2) * x_buf_bytes
                   + 2 * w_pad_bytes + 2 * out_buf_bytes + acc_bytes
                   + (2 << 20))                        # headroom / internal scratch
    vmem_limit = int(min(32 * 1024 * 1024, max(8 * 1024 * 1024, vmem_needed)))

    cost = pl.CostEstimate(
        flops=int(B * C * HW + mm_flops + 6 * B * K_out),
        transcendentals=int(B * K_out),
        bytes_accessed=int(x3.size * elem_bytes + w_raw_bytes
                           + B * K_out * out_itemsize),
    )

    out3 = pl.pallas_call(
        kernel,
        out_shape=jax.ShapeDtypeStruct((B, 1, K_out), out_dtype),
        grid_spec=pltpu.PrefetchScalarGridSpec(
            num_scalar_prefetch=0,
            grid=grid,
            in_specs=in_specs,
            out_specs=out_spec,
            scratch_shapes=[pltpu.VMEM((b_tile, C), jnp.float32)],
        ),
        compiler_params=pltpu.CompilerParams(
            dimension_semantics=("parallel", "arbitrary"),
            vmem_limit_bytes=vmem_limit,
        ),
        cost_estimate=cost,
    )(*args)
    return out3.reshape(B, K_out)


# ----------------------------- init / reference ---------------------------- #

def init_attention_params(key, in_planes, ratio, K):
    """kaiming_normal_(mode='fan_out', nonlinearity='relu') init for the 1x1
    conv weights (bias=False everywhere), PyTorch (out, in) layout."""
    use_hidden = in_planes > ratio
    if use_hidden:
        hidden = in_planes // ratio
        k1, k2 = jax.random.split(key)
        w1 = jax.random.normal(k1, (hidden, in_planes), jnp.float32) * jnp.sqrt(2.0 / hidden)
        w2 = jax.random.normal(k2, (K, hidden), jnp.float32) * jnp.sqrt(2.0 / K)
        return (w1, w2)
    w = jax.random.normal(key, (K, in_planes), jnp.float32) * jnp.sqrt(2.0 / K)
    return (w,)


def attention_reference(x_nchw, weights, *, temprature=30.0):
    """Pure-JAX reference mirroring the PyTorch forward."""
    avg = jnp.mean(x_nchw.astype(jnp.float32), axis=(2, 3))       # (B, C)
    if len(weights) == 2:
        w1, w2 = weights
        h = jnp.maximum(avg @ w1.T, 0.0)
        att = h @ w2.T
    else:
        att = avg @ weights[0].T
    return jax.nn.softmax(att / temprature, axis=-1)


# TODO(synk): update_temprature() is a host-side training-schedule scalar; it has
# no kernel equivalent and is simply the `temprature` argument here.

# ------------------------------- main -------------------------------------- #

if __name__ == "__main__":
    temprature = 30.0
    key = jax.random.PRNGKey(0)
    kx, kw, kx2, kw2 = jax.random.split(key, 4)

    # --- main case: hidden-layer path, f32, single spatial tile, 2 batch steps
    B, C, H, W = 2, 4, 16, 16          # in_planes = 4
    ratio, K = 2, 4                    # in_planes > ratio -> hidden layer path
    x = jax.random.normal(kx, (B, C, H, W), jnp.float32)
    weights = init_attention_params(kw, C, ratio, K)

    out = jax.block_until_ready(attention_forward(x, weights, temprature=temprature))
    ref = attention_reference(x, weights, temprature=temprature)
    assert out.shape == (B, K)
    assert jnp.allclose(out, ref, atol=2e-3, rtol=2e-3), (out, ref)

    # --- multi-tile spatial streaming (exercise grid + accumulator) ---------
    out_mt = jax.block_until_ready(
        attention_forward(x, weights, temprature=temprature, max_tile_bytes=4096))
    assert jnp.allclose(out_mt, ref, atol=2e-3, rtol=2e-3), (out_mt, ref)

    # --- bf16, HW not a multiple of the tile (in-kernel masking), single conv
    B2, C2, H2, W2 = 2, 4, 13, 13      # HW = 169 -> partial last 128-lane tile
    ratio2, K2 = 4, 4                  # in_planes <= ratio -> single conv path
    x2 = jax.random.normal(kx2, (B2, C2, H2, W2), jnp.float32).astype(jnp.bfloat16)
    weights2 = init_attention_params(kw2, C2, ratio2, K2)
    out2 = jax.block_until_ready(
        attention_forward(x2, weights2, temprature=temprature, max_tile_bytes=4096))
    ref2 = attention_reference(x2, weights2, temprature=temprature)
    assert out2.shape == (B2, K2)
    assert jnp.allclose(out2.astype(jnp.float32), ref2, atol=1e-2, rtol=1e-2), (out2, ref2)

    print("KERNEL_OK")
</pallas_src>

<mosaic_0001>
module attributes {stable_mosaic.version = 11 : i64} {
  func.func @_attention_kernel_hidden(%arg0: i32, %arg1: i32, %arg2: memref<1x4x256xf32, #tpu.memory_space<vmem>>, %arg3: memref<4x2xf32, #tpu.memory_space<vmem>>, %arg4: memref<2x4xf32, #tpu.memory_space<vmem>>, %arg5: memref<1x1x4xf32, #tpu.memory_space<vmem>>, %arg6: memref<1x4xf32, #tpu.memory_space<vmem>>) attributes {dimension_semantics = [#tpu.dimension_semantics<parallel>, #tpu.dimension_semantics<arbitrary>], iteration_bounds = array<i64: 2, 1>, scalar_prefetch = 0 : i64, scratch_operands = 1 : i64, tpu.core_type = #tpu.core_type<tc>, window_params = [{transform_indices = @transform_0, window_bounds = array<i64: 1, 4, 256>}, {pipeline_mode = #tpu.pipeline_mode<synchronous>, transform_indices = @transform_1, window_bounds = array<i64: 4, 2>}, {pipeline_mode = #tpu.pipeline_mode<synchronous>, transform_indices = @transform_2, window_bounds = array<i64: 2, 4>}, {transform_indices = @transform_3, window_bounds = array<i64: 1, 1, 4>}]} {
    %c0_i32 = arith.constant 0 : i32
    %0 = arith.cmpi eq, %arg1, %c0_i32 : i32
    %1 = arith.extui %0 : i1 to i32
    %c0_i32_0 = arith.constant 0 : i32
    %2 = arith.cmpi ne, %1, %c0_i32_0 : i32
    scf.if %2 {
      %cst_9 = arith.constant 0.000000e+00 : f32
      %11 = vector.broadcast %cst_9 : f32 to vector<1x4xf32>
      %c0_10 = arith.constant 0 : index
      %c0_11 = arith.constant 0 : index
      %12 = vector.load %arg6[%c0_10, %c0_11] : memref<1x4xf32, #tpu.memory_space<vmem>>, vector<1x4xf32>
      tpu.vector_store %arg6[%c0_10, %c0_11], %11 {strides = array<i32>} : memref<1x4xf32, #tpu.memory_space<vmem>>, vector<1x4xf32>,
    } else {
    }
    %c0 = arith.constant 0 : index
    %c0_1 = arith.constant 0 : index
    %3 = vector.load %arg6[%c0, %c0_1] : memref<1x4xf32, #tpu.memory_space<vmem>>, vector<1x4xf32>
    %c0_2 = arith.constant 0 : index
    %c0_3 = arith.constant 0 : index
    %c0_4 = arith.constant 0 : index
    %4 = vector.load %arg2[%c0_2, %c0_3, %c0_4] : memref<1x4x256xf32, #tpu.memory_space<vmem>>, vector<1x4x256xf32>
    %cst = arith.constant dense<0.000000e+00> : vector<1x4xf32>
    %5 = vector.multi_reduction <add>, %4, %cst [2] : vector<1x4x256xf32> to vector<1x4xf32>
    %6 = arith.addf %3, %5 : vector<1x4xf32>
    %c0_5 = arith.constant 0 : index
    %c0_6 = arith.constant 0 : index
    %7 = vector.load %arg6[%c0_5, %c0_6] : memref<1x4xf32, #tpu.memory_space<vmem>>, vector<1x4xf32>
    tpu.vector_store %arg6[%c0_5, %c0_6], %6 {strides = array<i32>} : memref<1x4xf32, #tpu.memory_space<vmem>>, vector<1x4xf32>,
    %c0_i32_7 = arith.constant 0 : i32
    %8 = arith.cmpi eq, %arg1, %c0_i32_7 : i32
    %9 = arith.extui %8 : i1 to i32
    %c0_i32_8 = arith.constant 0 : i32
    %10 = arith.cmpi ne, %9, %c0_i32_8 : i32
    scf.if %10 {
      %c0_9 = arith.constant 0 : index
      %c0_10 = arith.constant 0 : index
      %11 = vector.load %arg6[%c0_9, %c0_10] : memref<1x4xf32, #tpu.memory_space<vmem>>, vector<1x4xf32>
      %cst_11 = arith.constant 3.906250e-03 : f32
      %12 = vector.broadcast %cst_11 : f32 to vector<1x4xf32>
      %13 = arith.mulf %11, %12 : vector<1x4xf32>
      %c0_12 = arith.constant 0 : index
      %c0_13 = arith.constant 0 : index
      %14 = vector.load %arg3[%c0_12, %c0_13] : memref<4x2xf32, #tpu.memory_space<vmem>>, vector<4x2xf32>
      %cst_14 = arith.constant dense<0.000000e+00> : vector<1x2xf32>
      %15 = tpu.matmul %13, %14, %cst_14 {dimension_numbers = #tpu.dot_dimension_numbers<[1], [0], [0], [1], [0, 0, 1, 1], [], []>} : vector<1x4xf32>, vector<4x2xf32>, vector<1x2xf32> -> vector<1x2xf32>
      %cst_15 = arith.constant 0.000000e+00 : f32
      %16 = vector.broadcast %cst_15 : f32 to vector<1x2xf32>
      %17 = arith.maximumf %15, %16 : vector<1x2xf32>
      %c0_16 = arith.constant 0 : index
      %c0_17 = arith.constant 0 : index
      %18 = vector.load %arg4[%c0_16, %c0_17] : memref<2x4xf32, #tpu.memory_space<vmem>>, vector<2x4xf32>
      %cst_18 = arith.constant dense<0.000000e+00> : vector<1x4xf32>
      %19 = tpu.matmul %17, %18, %cst_18 {dimension_numbers = #tpu.dot_dimension_numbers<[1], [0], [0], [1], [0, 0, 1, 1], [], []>} : vector<1x2xf32>, vector<2x4xf32>, vector<1x4xf32> -> vector<1x4xf32>
      %cst_19 = arith.constant 0.0333333351 : f32
      %20 = vector.broadcast %cst_19 : f32 to vector<1x4xf32>
      %21 = arith.mulf %19, %20 : vector<1x4xf32>
      %cst_20 = arith.constant dense<0xFF800000> : vector<1xf32>
      %22 = vector.multi_reduction <maximumf>, %21, %cst_20 [1] : vector<1x4xf32> to vector<1xf32>
      %23 = vector.shape_cast %22 : vector<1xf32> to vector<1x1xf32>
      %24 = vector.broadcast %23 : vector<1x1xf32> to vector<1x4xf32>
      %25 = arith.subf %21, %24 : vector<1x4xf32>
      %26 = math.exp %25 : vector<1x4xf32>
      %cst_21 = arith.constant dense<0.000000e+00> : vector<1xf32>
      %27 = vector.multi_reduction <add>, %26, %cst_21 [1] : vector<1x4xf32> to vector<1xf32>
      %28 = vector.shape_cast %27 : vector<1xf32> to vector<1x1xf32>
      %29 = tpu.reciprocal %28 {approx = true} : vector<1x1xf32> -> vector<1x1xf32>
      %30 = vector.broadcast %29 : vector<1x1xf32> to vector<1x4xf32>
      %31 = arith.mulf %26, %30 : vector<1x4xf32>
      %c0_22 = arith.constant 0 : index
      %c0_23 = arith.constant 0 : index
      %c0_24 = arith.constant 0 : index
      %32 = vector.load %arg5[%c0_22, %c0_23, %c0_24] : memref<1x1x4xf32, #tpu.memory_space<vmem>>, vector<1x1x4xf32>
      %33 = vector.shape_cast %32 : vector<1x1x4xf32> to vector<1x4xf32>
      %34 = vector.shape_cast %31 : vector<1x4xf32> to vector<1x1x4xf32>
      tpu.vector_store %arg5[%c0_22, %c0_23, %c0_24], %34 {strides = array<i32>} : memref<1x1x4xf32, #tpu.memory_space<vmem>>, vector<1x1x4xf32>,
    } else {
    }
    return
  }
  func.func @transform_0(%arg0: i32, %arg1: i32) -> (i32, i32, i32) {
    %c0_i32 = arith.constant 0 : i32
    %c0_i32_0 = arith.constant 0 : i32
    return %arg0, %c0_i32, %arg1 : i32, i32, i32
  }
  func.func @transform_1(%arg0: i32, %arg1: i32) -> (i32, i32) {
    %c0_i32 = arith.constant 0 : i32
    %c0_i32_0 = arith.constant 0 : i32
    %c0_i32_1 = arith.constant 0 : i32
    return %c0_i32, %c0_i32_0 : i32, i32
  }
  func.func @transform_2(%arg0: i32, %arg1: i32) -> (i32, i32) {
    %c0_i32 = arith.constant 0 : i32
    %c0_i32_0 = arith.constant 0 : i32
    %c0_i32_1 = arith.constant 0 : i32
    return %c0_i32, %c0_i32_0 : i32, i32
  }
  func.func @transform_3(%arg0: i32, %arg1: i32) -> (i32, i32, i32) {
    %c0_i32 = arith.constant 0 : i32
    %c0_i32_0 = arith.constant 0 : i32
    %c0_i32_1 = arith.constant 0 : i32
    return %arg0, %c0_i32, %c0_i32_0 : i32, i32, i32
  }
}

</mosaic_0001>

<bundles_post_ra>
// kernel: tpu_custom_call.1
= control target key start
LH: loop header
LB: loop body
LE: loop exit
PB: predicated region body
PF: predicated region fallthrough
CT: control target
= control target key end

     0   :  { %8 = vsyncpa [#allocation4], 0  ;;  %s984_s0 = inlined_call_operand.hbm [shape: f32[2,4,256], index: 0, kind: input, shape index: {}]   ;;  %s985_s1 = inlined_call_operand.vmem [shape: f32[4,2], index: 1, kind: input, shape index: {}]   ;;  %s986_s2 = inlined_call_operand.vmem [shape: f32[2,4], index: 2, kind: input, shape index: {}]   ;;  %s987_s3 = inlined_call_operand.hbm [shape: f32[2,1,4], index: 3, kind: output, shape index: {}]  }
   0x1   :  { %10 = vsyncpa [#allocation4 + $0x1], 0 }
   0x2   :  { %11 = vsyncpa [#allocation5], 0 }
   0x3   :  { %13 = vsyncpa [#allocation5 + $0x1], 0  ;;  %s797_s12 = smov 0   ;;  %s799_s13 = smov 0  }
   0x4   :  { %s801_s14 = smov 0   ;;  %s803_s15 = smov 0  }
   0x5   :  { %s805_s16 = smov 0   ;;  %s807_s17 = smov 0  }
   0x6 LB: > { %s554_s18 = sadd.s32 4294967295, %s769_s17   ;;  %s555_s19 = sadd.s32 4294967294, %s769_s17   ;;  %s769_s17 = sphi %s807_s17, %s19_s17   ;;  %s765_s16 = sphi %s805_s16, %s1003_s16   ;;  %s761_s15 = sphi %s803_s15, %s1002_s15   ;;  %s757_s14 = sphi %s801_s14, %s1001_s14   ;;  %s753_s13 = sphi %s799_s13, %s1000_s13   ;;  %s749_s12 = sphi %s797_s12, %s999_s12  }
   0x7   : > { %s31_s20 = sadd.s32 1, %s765_s16  ;;  %s40_s21 = sadd.s32 1, %s757_s14 }
   0x8   : > { %p33_p0 = scmp.ge.s32.totalorder %s31_s20, 2  ;;  %p47_p1 = scmp.ne.s32.totalorder %s757_s14, %s753_s13 }
   0x9   : > { %p48_p2 = scmp.eq.s32.totalorder %s769_s17, 0  ;;  %p53_p3 = scmp.ne.s32.totalorder %s753_s13, %s749_s12 }
   0xa   : > { %s1005_s20 = smov (%p33_p0, %s31_s20), 0  ;;  %p54_p5 = scmp.eq.s32.totalorder %s554_s18, 0 }
   0xb   : > { %p838_p4 = por %p48_p2, %p47_p1  ;;  %s35_s23 = ssub.s32 %s765_s16, %s1005_s20 }
   0xc   : > { %p119_p6 = scmp.eq.s32.totalorder %s554_s18, 1  ;;  %p38_p7 = scmp.eq.s32.totalorder %s35_s23, 0 }
   0xd   : > { %p844_p8 = por %p54_p5, %p53_p3  ;;  %p125_p10 = scmp.eq.s32.totalorder %s555_s19, 1 }
   0xe   : > { %p848_p9 = por %p119_p6, %p47_p1  ;;  %p597_p13 = scmp.lt.s32.totalorder %s769_s17, 2 }
   0xf   : > { %s853_s26 = scalar_select %p38_p7, %s757_s14, %s40_s21  }
  0x10   : > { %s991_s25 = scalar_select %p848_p9, 1, 0 }
  0x11   : > { %p855_p11 = por %p125_p10, %p53_p3  ;;  %s151_s28 = sand.u32 1, %s757_s14  }
  0x12   : > { %s558_s29 = sshll.u32 %s151_s28, 3  ;;  %s570_s30 = sshll.u32 %s765_s16, 7 }
  0x13   : > { %s992_s27 = scalar_select %p855_p11, 1, 0 }
  0x14   : > { %s866_s6 = scalar_lea.hbm %s984_s0, %s570_s30  ;;  %s155_s7 = scalar_lea.vmem [#allocation3], %s558_s29 }
  0x15   : > { %s165_s8 = sshll.u32 %s155_s7, 4  ;;  %p872_p0 = pnand %p597_p13, %p838_p4  ;;  %s868_s8 = int_to_ptr.vmem [resolvable:$true] %s165_s8 }
  0x16   : > { %s152_s10 = scalar_lea.sflag [#allocation4], %s151_s28  ;;  %s657_s11 = scalar_lea.hbm %s866_s6, 128 }
  0x17   : > { %p658_p3 = scmp.ne.s32.totalorder %s866_s6, %s657_s11  ;;  %p659_p5 = pneg %p872_p0 }
  0x18   : > { %s662_s21 = scalar_lea.hbm %s984_s0, 256  ;;  %p663_p4 = scmp.lt.u32.totalorder %s866_s6, %s984_s0 }
  0x19   : > { %p660_p6 = pnand %p659_p5, %p658_p3  ;;  %p664_p10 = scmp.lt.u32.totalorder %s662_s21, %s657_s11 }
  0x1a   : > { %p666_p12 = scmp.lt.u32.totalorder %s657_s11, %s866_s6 }
  0x1b   : > { %p661_p7 = pneg %p660_p6  ;;  %p665_p13 = por %p664_p10, %p663_p4 }
  0x1d   : > { %p667_p1 = por %p666_p12, %p665_p13 }
  0x1f   : > { %p668_p2 = pnand %p667_p1, %p661_p7 }
  0x21   : > { %671 = shalt.err (!%p668_p2)
}
  0x22   : > { %s672_s28 = scalar_lea.vmem %s868_s8, 128  ;;  %s771_s29 = smov [#allocation3]  }
  0x23   : > { %p673_p3 = scmp.ne.s32.totalorder %s868_s8, %s672_s28  ;;  %s677_s30 = sshll.u32 %s771_s29, 4  ;;  %s678_s30 = int_to_ptr.vmem [resolvable:$false] %s677_s30 }
  0x24   : > { %s679_s4 = scalar_lea.vmem %s678_s30, 256  ;;  %p680_p9 = scmp.lt.s32.totalorder %s868_s8, %s678_s30 }
  0x25   : > { %p675_p6 = pnand %p673_p3, %p659_p5  ;;  %p681_p4 = scmp.lt.s32.totalorder %s679_s4, %s672_s28 }
  0x27   : > { %p676_p11 = pneg %p675_p6  ;;  %p682_p10 = por %p681_p4, %p680_p9 }
  0x29   : > { %p683_p12 = pnand %p682_p10, %p676_p11 }
  0x2b   : > { %686 = shalt.err (!%p683_p12)
}
  0x2c   : > { %592 = dma.hbm_to_vmem [thread:$0]  (!%p872_p0), %s866_s6, 128, %s868_s8, %s152_s10  }
  0x2d   : > { %p994_p1 = scmp.lt.s32.totalorder %s769_s17, 3  ;;  %p995_p2 = scmp.ge.s32.totalorder %s769_s17, 1 }
  0x2f   : > { %p171_p5 = pnand %p995_p2, %p994_p1 }
  0x30   : > { %s908_s5 = sand.u32 (!%p171_p5), 1, %s753_s13  }
  0x31   : > { %174 = sbr.rel (%p171_p5) target bundleno = 1117 (0x45d), region = 32  ;;  %s562_s7 = sshll.u32 (!%p171_p5), %s908_s5, 3 }
  0x32   : > { %s177_s11 = scalar_lea.sflag (!%p171_p5), [#allocation4], %s908_s5  ;;  %s180_s18 = scalar_lea.vmem (!%p171_p5), [#allocation3], %s562_s7 }
  0x38   : > { %740 = dma.done.wait (%p844_p8), %s177_s11, 128  }
  0x39   : > { %742 = vsyncadd (%p844_p8), %s177_s11, 4294967168  ;;  %vm214_vm0 = vcmask 1043456   ;;  %v210_v0 = vld [vmem:[%s180_s18] sm:$0xff]  ;;  %v772_v5 = vmov 0   ;;  %v221_v6 = vlaneseq  ;;  %v773_v10 = vmov 1966171168  }
  0x3a   : > { %v212_v1 = vcombine.high %v210_v0, %v210_v0  ;;  %v215_v2 = vsel %vm214_vm0, %v210_v0, 0.0  ;;  %651 = vset.pattern.permute.xlu0 %v772_v5  ;;  %v240_v11 = vunpack.c.l.s4 %v773_v10  ;;  %vm207_vm1 = vcmask 24576   ;;  %v293_v30 = vld [vmem:[%s985_s1] sm:$0xf]  ;;  %s567_s10 = sshll.u32 %s761_s15, 4  ;;  %s201_s19 = scalar_lea.vmem [#allocation6], %s908_s5 }
  0x3b   : > { %v222_v7 = vshrl.u32 %v221_v6, 7  ;;  %v265_v8 = vand.u32 127, %v221_v6  ;;  %v774_v29 = vmov 0.0   ;;  %vm775_vm2 = vmmov 0   ;;  %v372_v39 = vld [vmem:[%s986_s2] sm:$0x3]  ;;  %s934_s28 = scalar_lea.hbm %s987_s3, %s567_s10 }
  0x3c   : > { %v216_v3 = vsel %vm214_vm0, %v212_v1, 0.0  ;;  %v241_v12 = vunpack.c.0.s8 %v240_v11  ;;  %208 = vst.msk [vmem:[#allocation2] sm:$0x1] %vm207_vm1, %v774_v29  ;;  %575 = vmatprep.subr.mxu0 %v774_v29  ;;  %580 = vmatprep.subr.mxu1 %v774_v29  ;;  %vm294_vm3 = vcmask 31744   ;;  %vm377_vm4 = vcmask 1041408   ;;  %s477_s21 = sshll.u32 %s201_s19, 4  ;;  %s936_s21 = int_to_ptr.vmem [resolvable:$true] %s477_s21 }
  0x3d   : > { %v217_v4 = vadd.f32 %v216_v3, %v215_v2  ;;  %v268_v9 = vsub.s32 %v265_v8, %v222_v7  ;;  %v223_v13 = vsub.s32 0, %v222_v7  ;;  %v227_v14 = vsub.s32 1, %v222_v7  ;;  %576 = vmatpush3.msk.msra.mxu0 %vm214_vm0, %v293_v30  ;;  %577 = vmatprep.mubr.msk.f32.mxu0 %vm775_vm2, %v774_v29  ;;  %s465_s29 = scalar_lea.sflag [#allocation5], %s908_s5  ;;  %s687_s30 = scalar_lea.vmem %s936_s21, 16 }
  0x3e   : > { %v231_v15 = vsub.s32 2, %v222_v7  ;;  %v235_v16 = vsub.s32 3, %v222_v7  ;;  %v244_v18 = vsub.s32 %v241_v12, %v222_v7  ;;  %582 = vmatprep.mubr.msk.f32.mxu1 %vm775_vm2, %v774_v29  ;;  %581 = vmatpush3.msk.msra.mxu1 %vm377_vm4, %v372_v39  ;;  %vm373_vm5 = vcmask 15360   ;;  %p688_p8 = scmp.ne.s32.totalorder %s936_s21, %s687_s30  ;;  %p996_p9 = scmp.ne.s32.totalorder %s991_s25, 0 }
  0x3f   : > { %218 = vadd.xlane.f32.xlu0 %v217_v4  ;;  %s776_s15 = smov [#allocation6]  }
  0x40   : > { %p689_p11 = pnand %p688_p8, %p996_p9  ;;  %s691_s4 = sshll.u32 %s776_s15, 4  ;;  %s692_s4 = int_to_ptr.vmem [resolvable:$false] %s691_s4 }
  0x41   : > { %s693_s7 = scalar_lea.vmem %s692_s4, 32  ;;  %p694_p7 = scmp.lt.s32.totalorder %s936_s21, %s692_s4 }
  0x42   : > { %p690_p0 = pneg %p689_p11  ;;  %p695_p13 = scmp.lt.s32.totalorder %s693_s7, %s687_s30 }
  0x43   : > { %v209_v34 = vld [vmem:[#allocation2] sm:$0x1] }
  0x44   : > { %p696_p3 = por %p695_p13, %p694_p7 }
  0x46   : > { %p697_p6 = pnand %p696_p3, %p690_p0 }
  0xcc   : > { %v219_v17 = vpop.xlane.xlu0 %218 }
  0xcd   : > { %v224_v19 = vrot.slane %v219_v17, %v223_v13  ;;  %v228_v20 = vrot.slane %v219_v17, %v227_v14  ;;  %v232_v21 = vrot.slane %v219_v17, %v231_v15  ;;  %v236_v22 = vrot.slane %v219_v17, %v235_v16 }
  0xcf   : > { %v237_v23 = vcombine.low %v224_v19, %v228_v20  ;;  %v238_v24 = vcombine.low %v232_v21, %v236_v22 }
  0xd1   : > { %v245_v25 = vrot.slane %v237_v23, %v244_v18  ;;  %v252_v26 = vrot.slane %v238_v24, %v244_v18 }
  0xd3   : > { %v253_v27 = vcombine.low %v245_v25, %v252_v26 }
  0xd5   : > { %v260_v28 = vrot.slane %v253_v27, %v244_v18 }
  0xd7   : > { %262 = vperm.xlu0 %651, %v260_v28  }
 0x156   : > { %v263_v31 = vpop.permute.xlu0 %262 }
 0x157   : > { %v269_v32 = vrot.slane %v263_v31, %v268_v9 }
 0x159   : > { %v276_v33 = vrot.slane %v269_v32, %v244_v18 }
 0x15b   : > { %v283_v35 = vrot.slane %v276_v33, %v244_v18 }
 0x15d   : > { %v285_v36 = vadd.f32 %v283_v35, %v209_v34 }
 0x15f   : > { %287 = vst.msk [vmem:[#allocation2] sm:$0x1] %vm207_vm1, %v285_v36 }
 0x166   : > { %v291_v37 = vld [vmem:[#allocation2] sm:$0x1] }
 0x167   : > { %v292_v38 = vmul.f32 0.00390625, %v291_v37 }
 0x169   : > { %578 = vmatmul.mubr.msk.f32.vlgmr.msra.gmra.mrb[0].mxu0 %vm294_vm3, %v292_v38 }
 0x23c   : > { %v367_v40 = vpop.f32.mrb[0].mxu0 }
 0x23d   : > { %v371_v41 = vmax.f32 %v367_v40, 0.0  ;;  %v579_v42 = vpop.f32.mrb[1].mxu0 }
 0x23f   : > { %583 = vmatmul.mubr.msk.f32.vlgmr.msra.gmra.mrb[0].mxu1 %vm373_vm5, %v371_v41 }
 0x312   : > { %v447_v43 = vpop.f32.mrb[0].mxu1 }
 0x313   : > { %v451_v44 = vmul.f32 0.033333335, %v447_v43  ;;  %v584_v45 = vpop.f32.mrb[1].mxu1 }
 0x315   : > { %v452_v46 = vsel %vm207_vm1, %v451_v44, -inf }
 0x316   : > { %453 = vmax.xlane.f32.xlu1 %v452_v46 }
 0x3a3   : > { %v454_v47 = vpop.xlane.xlu1 %453 }
 0x3a4   : > { %v455_v48 = vsub.f32 %v451_v44, %v454_v47 }
 0x3a6   : > { %v456_v49 = vmul.f32 1.442695, %v455_v48 }
 0x3a8   : > { %653 = vpow2.f32 %v456_v49 }
 0x3b2   : > { %v654_v50 = vpop.eup %653 }
 0x3b3   : > { %v458_v51 = vsel %vm207_vm1, %v654_v50, 0.0 }
 0x3b4   : > { %459 = vadd.xlane.f32.xlu1 %v458_v51 }
 0x441   : > { %v460_v52 = vpop.xlane.xlu1 %459 }
 0x442   : > { %655 = vrcp.f32 %v460_v52 }
 0x44c   : > { %v656_v53 = vpop.eup %655 }
 0x44d   : > { %v462_v54 = vmul.f32 %v656_v53, %v654_v50 }
 0x44f   : > { %463 = vst.msk [vmem:[%s201_s19] sm:$0x1] %vm207_vm1, %v462_v54 }
 0x450   : > { %700 = shalt.err (!%p697_p6)
}
 0x451   : > { %s701_s5 = scalar_lea.hbm %s934_s28, 16  ;;  %s705_s24 = scalar_lea.hbm %s987_s3, 32 }
 0x452   : > { %p702_p4 = scmp.ne.s32.totalorder %s934_s28, %s701_s5  ;;  %p706_p1 = scmp.lt.u32.totalorder %s934_s28, %s987_s3 }
 0x453   : > { %p707_p2 = scmp.lt.u32.totalorder %s705_s24, %s701_s5  ;;  %p709_p8 = scmp.lt.u32.totalorder %s701_s5, %s934_s28 }
 0x454   : > { %p703_p10 = pnand %p702_p4, %p996_p9 }
 0x455   : > { %p708_p5 = por %p707_p2, %p706_p1 }
 0x456   : > { %p704_p12 = pneg %p703_p10 }
 0x457   : > { %p710_p11 = por %p709_p8, %p708_p5 }
 0x459   : > { %p711_p0 = pnand %p710_p11, %p704_p12 }
 0x45b   : > { %714 = shalt.err (!%p711_p0)
}
 0x45c   : > { %587 = dma.vmem_to_hbm [thread:$0]  (%p996_p9), %s936_s21, 16, %s934_s28, %s465_s29  }
 0x45d PF: > { %s489_s9 = sand.u32 1, %s749_s12   ;;  %p997_p7 = scmp.ne.s32.totalorder %s992_s27, 0 }
 0x45e   : > { %p998_p13 = scmp.ge.s32.totalorder %s769_s17, 2  ;;  %s490_s10 = scalar_lea.sflag [#allocation5], %s489_s9 }
 0x460   : > { %p594_p3 = pnand %p998_p13, %p997_p7 }
 0x462   : > { %744 = dma.done.wait (!%p594_p3), %s490_s10, 16  }
 0x463   : > { %746 = vsyncadd (!%p594_p3), %s490_s10, 4294967280  ;;  %s19_s17 = sadd.s32 1, %s769_s17   ;;  %s999_s12 = smov %s753_s13 }
 0x464   : > { %p16_p6 = scmp.ge.s32.totalorder %s19_s17, 4   ;;  %s1000_s13 = smov %s757_s14 }
 0x465   : > { %s1001_s14 = smov %s853_s26  ;;  %s1002_s15 = smov %s765_s16 }
 0x466   : > { %s1003_s16 = smov %s1005_s20  ;;  %18 = sbr.rel (!%p16_p6) target bundleno = 6 (0x6), region = 85 }
 0x46d   :  { %494 = vsyncpa [#allocation4], 1 }
 0x46e   :  { %496 = vsyncpa [#allocation4 + $0x1], 1 }
 0x46f   :  { %497 = vsyncpa [#allocation5], 1 }
 0x470   :  { %499 = vsyncpa [#allocation5 + $0x1], 1 }

</bundles_post_ra>
